<compile_context>
chip_gen: v5e
topology: v5e:2x2
jax: 0.10.0
libtpu: 0.0.40
codegen_flags: <defaults>
</compile_context>

<pallas_src>
import jax
import jax.numpy as jnp
from jax.experimental import pallas as pl
from jax.experimental.pallas import tpu as pltpu

BN_EPS = 1e-5
HIDDEN = 512


def _round_up(x, m):
    return ((x + m - 1) // m) * m


def face_quality_kernel(x_ref, w1_ref, b_ref, wd_ref, o_ref):
    # Cast the x tile to the weight dtype in VMEM (VPU, hidden under DMA/MXU)
    # instead of materializing a casted copy of x in HBM.
    x = x_ref[...].astype(w1_ref.dtype)
    # Fused Linear(F->512) + folded BN: one MXU matmul (f32 accum) + bias + ReLU.
    h = jnp.dot(x, w1_ref[...], preferred_element_type=jnp.float32)
    h = jnp.maximum(h + b_ref[...], 0.0)
    # Linear(512->2) -> Softmax -> [:,0:1]  ==  sigmoid(h @ (w2[:,0]-w2[:,1])).
    # Kept as VPU mul + lane reduce (MXU is the binding unit; this hides under it).
    d = jnp.sum(h * wd_ref[...], axis=1, keepdims=True)          # (tb, 1), f32
    d = jnp.clip(d, -60.0, 60.0)                                 # numerical safety
    o_ref[...] = (1.0 / (1.0 + jnp.exp(-d))).astype(o_ref.dtype)


def fold_params(w1, gamma, beta, running_mean, running_var, w2,
                compute_dtype=jnp.float32):
    """Fold BN(eval) into the first Linear; precompute the softmax->sigmoid weight.

    compute_dtype=jnp.bfloat16 is recommended on v5e (and for large F on v7x)."""
    scale = gamma * jax.lax.rsqrt(running_var + BN_EPS)                 # (1, H)
    w1_folded = (w1 * scale).astype(compute_dtype)                      # (F, H)
    bias = (beta - running_mean * scale).astype(jnp.float32)            # (1, H)
    w_diff = (w2[:, 0] - w2[:, 1]).reshape(1, -1).astype(jnp.float32)   # (1, H)
    return w1_folded, bias, w_diff


def face_quality(x, w1_folded, bias, w_diff, *, block_b=1024):
    B, F = x.shape
    H = w1_folded.shape[1]
    w_dtype = w1_folded.dtype
    itm_x = jnp.dtype(x.dtype).itemsize
    itm_w = jnp.dtype(w_dtype).itemsize

    # Batch tile: 16-sublane multiple for 2-byte compute (packed bf16 vregs),
    # 8 otherwise; no wrapper-side padding -- last block may be ragged.
    mult = 16 if (itm_w == 2 and B >= 16) else 8
    tb = min(block_b, _round_up(B, mult))
    grid = (pl.cdiv(B, tb),)

    # VMEM need: double-buffered x tiles + single-buffered resident weight and
    # vectors + f32 activation tile; cap against the device's physical VMEM.
    vmem_need = (2 * tb * F * itm_x + F * H * itm_w + 2 * H * 4
                 + tb * H * 4 + 4 * tb * 4)
    try:
        vmem_phys = int(pltpu.get_tpu_info().vmem_capacity_bytes)
    except Exception:
        vmem_phys = 64 << 20  # conservative (v7x per-TC VMEM)
    vmem_limit = int(min(max(vmem_need + (2 << 20), 16 << 20), (vmem_phys * 3) // 4))

    cost = pl.CostEstimate(
        flops=2 * B * F * H + 4 * B * H,
        transcendentals=B,
        bytes_accessed=B * F * itm_x + F * H * itm_w + 2 * H * 4 + B * 4,
    )

    def _call(single_buffer_consts):
        if single_buffer_consts:
            # Constant index_map -> never re-fetched; single-buffer to halve
            # resident weight VMEM (matters on v7x's 64 MiB).
            def const(shape):
                return pl.BlockSpec(shape, lambda i: (0,) * len(shape),
                                    pipeline_mode=pl.Buffered(1))
        else:
            def const(shape):
                return pl.BlockSpec(shape, lambda i: (0,) * len(shape))

        return pl.pallas_call(
            face_quality_kernel,
            out_shape=jax.ShapeDtypeStruct((B, 1), jnp.float32),
            grid_spec=pltpu.PrefetchScalarGridSpec(
                num_scalar_prefetch=0,
                grid=grid,
                in_specs=[
                    pl.BlockSpec((tb, F), lambda i: (i, 0)),   # x tile (pipelined)
                    const((F, H)),                             # folded weight, resident
                    const((1, H)),                             # folded BN bias
                    const((1, H)),                             # w2[:,0] - w2[:,1]
                ],
                out_specs=pl.BlockSpec((tb, 1), lambda i: (i, 0)),
            ),
            compiler_params=pltpu.CompilerParams(
                dimension_semantics=("parallel",),
                vmem_limit_bytes=vmem_limit,
            ),
            cost_estimate=cost,
        )(x, w1_folded, bias, w_diff)

    try:
        return _call(True)
    except Exception:
        # Fallback: some jax versions may reject single-buffered pipeline_mode.
        return _call(False)


def xavier_uniform(key, fan_in, fan_out, shape):
    bound = jnp.sqrt(6.0 / (fan_in + fan_out))
    return jax.random.uniform(key, shape, dtype=jnp.float32, minval=-bound, maxval=bound)


def init_params(key, feature_dim, hidden=HIDDEN, n_out=2):
    k1, k2, k3, k4, k5, k6 = jax.random.split(key, 6)
    # PyTorch Linear weight is (out, in); we store the transpose (in, out).
    w1 = xavier_uniform(k1, feature_dim, hidden, (feature_dim, hidden))
    w2 = xavier_uniform(k2, hidden, n_out, (hidden, n_out))
    # Non-trivial BN params/stats so the BN-folding path is actually exercised.
    gamma = jax.random.uniform(k3, (1, hidden), jnp.float32, 0.5, 1.5)
    beta = 0.1 * jax.random.normal(k4, (1, hidden), jnp.float32)
    running_mean = 0.1 * jax.random.normal(k5, (1, hidden), jnp.float32)
    running_var = jax.random.uniform(k6, (1, hidden), jnp.float32, 0.5, 1.5)
    return w1, gamma, beta, running_mean, running_var, w2


def reference(x, w1, gamma, beta, running_mean, running_var, w2):
    # Unfused reference matching the original PyTorch module (eval mode).
    h = x @ w1
    h = (h - running_mean) / jnp.sqrt(running_var + BN_EPS) * gamma + beta
    h = jnp.maximum(h, 0.0)
    logits = h @ w2
    p = jax.nn.softmax(logits, axis=1)
    return p[:, 0:1]


if __name__ == "__main__":
    B, FEATURE_DIM = 8, 256

    key = jax.random.PRNGKey(0)
    kx, kp = jax.random.split(key)
    x = jax.random.normal(kx, (B, FEATURE_DIM), dtype=jnp.float32)
    params = init_params(kp, FEATURE_DIM)
    ref = reference(x, *params)

    # f32 path: must match the unfused reference tightly.
    folded32 = fold_params(*params, compute_dtype=jnp.float32)
    out32 = jax.block_until_ready(face_quality(x, *folded32))
    assert out32.shape == (B, 1), out32.shape
    assert jnp.allclose(out32, ref, atol=1e-5, rtol=1e-5), (out32, ref)

    # bf16 weight path (x cast in-kernel, f32 MXU accumulation, f32 epilogue).
    folded16 = fold_params(*params, compute_dtype=jnp.bfloat16)
    out16 = jax.block_until_ready(face_quality(x, *folded16))
    assert out16.shape == (B, 1), out16.shape
    assert jnp.allclose(out16, ref, atol=2e-2), (out16, ref)

    print("KERNEL_OK")
</pallas_src>

<mosaic_0001>
module attributes {stable_mosaic.version = 11 : i64} {
  func.func @face_quality_kernel(%arg0: i32, %arg1: memref<8x256xf32, #tpu.memory_space<vmem>>, %arg2: memref<256x512xf32, #tpu.memory_space<vmem>>, %arg3: memref<1x512xf32, #tpu.memory_space<vmem>>, %arg4: memref<1x512xf32, #tpu.memory_space<vmem>>, %arg5: memref<8x1xf32, #tpu.memory_space<vmem>>) attributes {dimension_semantics = [#tpu.dimension_semantics<parallel>], iteration_bounds = array<i64: 1>, scalar_prefetch = 0 : i64, scratch_operands = 0 : i64, tpu.core_type = #tpu.core_type<tc>, window_params = [{transform_indices = @transform_0, window_bounds = array<i64: 8, 256>}, {pipeline_mode = #tpu.pipeline_mode<synchronous>, transform_indices = @transform_1, window_bounds = array<i64: 256, 512>}, {pipeline_mode = #tpu.pipeline_mode<synchronous>, transform_indices = @transform_2, window_bounds = array<i64: 1, 512>}, {pipeline_mode = #tpu.pipeline_mode<synchronous>, transform_indices = @transform_3, window_bounds = array<i64: 1, 512>}, {transform_indices = @transform_4, window_bounds = array<i64: 8, 1>}]} {
    %c0 = arith.constant 0 : index
    %c0_0 = arith.constant 0 : index
    %0 = vector.load %arg1[%c0, %c0_0] : memref<8x256xf32, #tpu.memory_space<vmem>>, vector<8x256xf32>
    %c0_1 = arith.constant 0 : index
    %c0_2 = arith.constant 0 : index
    %1 = vector.load %arg2[%c0_1, %c0_2] : memref<256x512xf32, #tpu.memory_space<vmem>>, vector<256x512xf32>
    %cst = arith.constant dense<0.000000e+00> : vector<8x512xf32>
    %2 = tpu.matmul %0, %1, %cst {dimension_numbers = #tpu.dot_dimension_numbers<[1], [0], [0], [1], [0, 0, 1, 1], [], []>} : vector<8x256xf32>, vector<256x512xf32>, vector<8x512xf32> -> vector<8x512xf32>
    %c0_3 = arith.constant 0 : index
    %c0_4 = arith.constant 0 : index
    %3 = vector.load %arg3[%c0_3, %c0_4] : memref<1x512xf32, #tpu.memory_space<vmem>>, vector<1x512xf32>
    %4 = vector.broadcast %3 : vector<1x512xf32> to vector<8x512xf32>
    %5 = arith.addf %2, %4 : vector<8x512xf32>
    %cst_5 = arith.constant 0.000000e+00 : f32
    %6 = vector.broadcast %cst_5 : f32 to vector<8x512xf32>
    %7 = arith.maximumf %5, %6 : vector<8x512xf32>
    %c0_6 = arith.constant 0 : index
    %c0_7 = arith.constant 0 : index
    %8 = vector.load %arg4[%c0_6, %c0_7] : memref<1x512xf32, #tpu.memory_space<vmem>>, vector<1x512xf32>
    %9 = vector.broadcast %8 : vector<1x512xf32> to vector<8x512xf32>
    %10 = arith.mulf %7, %9 : vector<8x512xf32>
    %cst_8 = arith.constant dense<0.000000e+00> : vector<8xf32>
    %11 = vector.multi_reduction <add>, %10, %cst_8 [1] : vector<8x512xf32> to vector<8xf32>
    %12 = vector.shape_cast %11 : vector<8xf32> to vector<8x1xf32>
    %cst_9 = arith.constant -6.000000e+01 : f32
    %cst_10 = arith.constant 6.000000e+01 : f32
    %13 = vector.broadcast %cst_9 : f32 to vector<8x1xf32>
    %14 = arith.maximumf %13, %12 : vector<8x1xf32>
    %15 = vector.broadcast %cst_10 : f32 to vector<8x1xf32>
    %16 = arith.minimumf %15, %14 : vector<8x1xf32>
    %cst_11 = arith.constant 0.000000e+00 : f32
    %17 = vector.broadcast %cst_11 : f32 to vector<8x1xf32>
    %18 = arith.subf %17, %16 : vector<8x1xf32>
    %19 = math.exp %18 : vector<8x1xf32>
    %cst_12 = arith.constant 1.000000e+00 : f32
    %20 = vector.broadcast %cst_12 : f32 to vector<8x1xf32>
    %21 = arith.addf %20, %19 : vector<8x1xf32>
    %cst_13 = arith.constant 1.000000e+00 : f32
    %22 = vector.broadcast %cst_13 : f32 to vector<8x1xf32>
    %23 = arith.divf %22, %21 : vector<8x1xf32>
    %c0_14 = arith.constant 0 : index
    %c0_15 = arith.constant 0 : index
    %24 = vector.load %arg5[%c0_14, %c0_15] : memref<8x1xf32, #tpu.memory_space<vmem>>, vector<8x1xf32>
    tpu.vector_store %arg5[%c0_14, %c0_15], %23 {strides = array<i32>} : memref<8x1xf32, #tpu.memory_space<vmem>>, vector<8x1xf32>,
    return
  }
  func.func @transform_0(%arg0: i32) -> (i32, i32) {
    %c0_i32 = arith.constant 0 : i32
    %c0_i32_0 = arith.constant 0 : i32
    return %arg0, %c0_i32 : i32, i32
  }
  func.func @transform_1(%arg0: i32) -> (i32, i32) {
    %c0_i32 = arith.constant 0 : i32
    %c0_i32_0 = arith.constant 0 : i32
    %c0_i32_1 = arith.constant 0 : i32
    return %c0_i32, %c0_i32_0 : i32, i32
  }
  func.func @transform_2(%arg0: i32) -> (i32, i32) {
    %c0_i32 = arith.constant 0 : i32
    %c0_i32_0 = arith.constant 0 : i32
    %c0_i32_1 = arith.constant 0 : i32
    return %c0_i32, %c0_i32_0 : i32, i32
  }
  func.func @transform_3(%arg0: i32) -> (i32, i32) {
    %c0_i32 = arith.constant 0 : i32
    %c0_i32_0 = arith.constant 0 : i32
    %c0_i32_1 = arith.constant 0 : i32
    return %c0_i32, %c0_i32_0 : i32, i32
  }
  func.func @transform_4(%arg0: i32) -> (i32, i32) {
    %c0_i32 = arith.constant 0 : i32
    %c0_i32_0 = arith.constant 0 : i32
    return %arg0, %c0_i32 : i32, i32
  }
}

module attributes {stable_mosaic.version = 11 : i64} {
  func.func @face_quality_kernel(%arg0: i32, %arg1: memref<8x256xf32, #tpu.memory_space<vmem>>, %arg2: memref<256x512xf32, #tpu.memory_space<vmem>>, %arg3: memref<1x512xf32, #tpu.memory_space<vmem>>, %arg4: memref<1x512xf32, #tpu.memory_space<vmem>>, %arg5: memref<8x1xf32, #tpu.memory_space<vmem>>) attributes {dimension_semantics = [#tpu.dimension_semantics<parallel>], iteration_bounds = array<i64: 1>, scalar_prefetch = 0 : i64, scratch_operands = 0 : i64, tpu.core_type = #tpu.core_type<tc>, window_params = [{transform_indices = @transform_0, window_bounds = array<i64: 8, 256>}, {pipeline_mode = #tpu.pipeline_mode<synchronous>, transform_indices = @transform_1, window_bounds = array<i64: 256, 512>}, {pipeline_mode = #tpu.pipeline_mode<synchronous>, transform_indices = @transform_2, window_bounds = array<i64: 1, 512>}, {pipeline_mode = #tpu.pipeline_mode<synchronous>, transform_indices = @transform_3, window_bounds = array<i64: 1, 512>}, {transform_indices = @transform_4, window_bounds = array<i64: 8, 1>}]} {
    %c0 = arith.constant 0 : index
    %c0_0 = arith.constant 0 : index
    %0 = vector.load %arg1[%c0, %c0_0] : memref<8x256xf32, #tpu.memory_space<vmem>>, vector<8x256xf32>
    %c0_1 = arith.constant 0 : index
    %c0_2 = arith.constant 0 : index
    %1 = vector.load %arg2[%c0_1, %c0_2] : memref<256x512xf32, #tpu.memory_space<vmem>>, vector<256x512xf32>
    %cst = arith.constant dense<0.000000e+00> : vector<8x512xf32>
    %2 = tpu.matmul %0, %1, %cst {dimension_numbers = #tpu.dot_dimension_numbers<[1], [0], [0], [1], [0, 0, 1, 1], [], []>} : vector<8x256xf32>, vector<256x512xf32>, vector<8x512xf32> -> vector<8x512xf32>
    %c0_3 = arith.constant 0 : index
    %c0_4 = arith.constant 0 : index
    %3 = vector.load %arg3[%c0_3, %c0_4] : memref<1x512xf32, #tpu.memory_space<vmem>>, vector<1x512xf32>
    %4 = vector.broadcast %3 : vector<1x512xf32> to vector<8x512xf32>
    %5 = arith.addf %2, %4 : vector<8x512xf32>
    %cst_5 = arith.constant 0.000000e+00 : f32
    %6 = vector.broadcast %cst_5 : f32 to vector<8x512xf32>
    %7 = arith.maximumf %5, %6 : vector<8x512xf32>
    %c0_6 = arith.constant 0 : index
    %c0_7 = arith.constant 0 : index
    %8 = vector.load %arg4[%c0_6, %c0_7] : memref<1x512xf32, #tpu.memory_space<vmem>>, vector<1x512xf32>
    %9 = vector.broadcast %8 : vector<1x512xf32> to vector<8x512xf32>
    %10 = arith.mulf %7, %9 : vector<8x512xf32>
    %cst_8 = arith.constant dense<0.000000e+00> : vector<8xf32>
    %11 = vector.multi_reduction <add>, %10, %cst_8 [1] : vector<8x512xf32> to vector<8xf32>
    %12 = vector.shape_cast %11 : vector<8xf32> to vector<8x1xf32>
    %cst_9 = arith.constant -6.000000e+01 : f32
    %cst_10 = arith.constant 6.000000e+01 : f32
    %13 = vector.broadcast %cst_9 : f32 to vector<8x1xf32>
    %14 = arith.maximumf %13, %12 : vector<8x1xf32>
    %15 = vector.broadcast %cst_10 : f32 to vector<8x1xf32>
    %16 = arith.minimumf %15, %14 : vector<8x1xf32>
    %cst_11 = arith.constant 0.000000e+00 : f32
    %17 = vector.broadcast %cst_11 : f32 to vector<8x1xf32>
    %18 = arith.subf %17, %16 : vector<8x1xf32>
    %19 = math.exp %18 : vector<8x1xf32>
    %cst_12 = arith.constant 1.000000e+00 : f32
    %20 = vector.broadcast %cst_12 : f32 to vector<8x1xf32>
    %21 = arith.addf %20, %19 : vector<8x1xf32>
    %cst_13 = arith.constant 1.000000e+00 : f32
    %22 = vector.broadcast %cst_13 : f32 to vector<8x1xf32>
    %23 = arith.divf %22, %21 : vector<8x1xf32>
    %c0_14 = arith.constant 0 : index
    %c0_15 = arith.constant 0 : index
    %24 = vector.load %arg5[%c0_14, %c0_15] : memref<8x1xf32, #tpu.memory_space<vmem>>, vector<8x1xf32>
    tpu.vector_store %arg5[%c0_14, %c0_15], %23 {strides = array<i32>} : memref<8x1xf32, #tpu.memory_space<vmem>>, vector<8x1xf32>,
    return
  }
  func.func @transform_0(%arg0: i32) -> (i32, i32) {
    %c0_i32 = arith.constant 0 : i32
    %c0_i32_0 = arith.constant 0 : i32
    return %arg0, %c0_i32 : i32, i32
  }
  func.func @transform_1(%arg0: i32) -> (i32, i32) {
    %c0_i32 = arith.constant 0 : i32
    %c0_i32_0 = arith.constant 0 : i32
    %c0_i32_1 = arith.constant 0 : i32
    return %c0_i32, %c0_i32_0 : i32, i32
  }
  func.func @transform_2(%arg0: i32) -> (i32, i32) {
    %c0_i32 = arith.constant 0 : i32
    %c0_i32_0 = arith.constant 0 : i32
    %c0_i32_1 = arith.constant 0 : i32
    return %c0_i32, %c0_i32_0 : i32, i32
  }
  func.func @transform_3(%arg0: i32) -> (i32, i32) {
    %c0_i32 = arith.constant 0 : i32
    %c0_i32_0 = arith.constant 0 : i32
    %c0_i32_1 = arith.constant 0 : i32
    return %c0_i32, %c0_i32_0 : i32, i32
  }
  func.func @transform_4(%arg0: i32) -> (i32, i32) {
    %c0_i32 = arith.constant 0 : i32
    %c0_i32_0 = arith.constant 0 : i32
    return %arg0, %c0_i32 : i32, i32
  }
}

</mosaic_0001>

<bundles_post_ra>
// kernel: tpu_custom_call.1
= control target key start
LH: loop header
LB: loop body
LE: loop exit
PB: predicated region body
PF: predicated region fallthrough
CT: control target
= control target key end

     0   :  { %9 = vsyncpa [#allocation3], 0  ;;  %s586_s0 = inlined_call_operand.hbm [shape: f32[8,256], index: 0, kind: input, shape index: {}]   ;;  %s587_s1 = inlined_call_operand.hbm [shape: f32[256,512], index: 1, kind: input, shape index: {}]   ;;  %s588_s2 = inlined_call_operand.hbm [shape: f32[1,512], index: 2, kind: input, shape index: {}]   ;;  %s589_s3 = inlined_call_operand.hbm [shape: f32[1,512], index: 3, kind: input, shape index: {}]   ;;  %s590_s4 = inlined_call_operand.vmem [shape: f32[8,1], index: 4, kind: output, shape index: {}]  }
   0x1   :  { %10 = vsyncpa [#allocation5], 0  ;;  %s27_s17 = sshll.u32 %s587_s1, 4  ;;  %s28_s17 = int_to_ptr.hbm [resolvable:$true] %s27_s17 }
   0x2   :  { %11 = vsyncpa [#allocation8], 0  ;;  %s540_s18 = smov [#allocation4]   ;;  %s17_s22 = sshll.u32 %s586_s0, 4  ;;  %s18_s22 = int_to_ptr.hbm [resolvable:$true] %s17_s22 }
   0x3   :  { %s29_s19 = sshll.u32 %s540_s18, 4  ;;  %s541_s23 = smov 512   ;;  %s30_s19 = int_to_ptr.vmem [resolvable:$true] %s29_s19 }
   0x4   :  { %s542_s24 = smov 32   ;;  %s543_s25 = smov [#allocation2]  }
   0x5   :  { %35 = dma.hbm_to_vmem [thread:$0]  %s28_s17, 16384, %s30_s19, [#allocation5], %s541_s23, %s541_s23, %s542_s24  }
   0x6   :  { %s19_s26 = sshll.u32 %s543_s25, 4  ;;  %s41_s29 = sshll.u32 %s588_s2, 4  ;;  %s20_s26 = int_to_ptr.vmem [resolvable:$true] %s19_s26  ;;  %s42_s29 = int_to_ptr.hbm [resolvable:$true] %s41_s29 }
   0x7   :  { %22 = dma.hbm_to_vmem [thread:$0]  %s18_s22, 256, %s20_s26, [#allocation3]  }
   0x8   :  { %s52_s5 = sshll.u32 %s589_s3, 4  ;;  %s544_s6 = smov [#allocation6]   ;;  %s53_s5 = int_to_ptr.hbm [resolvable:$true] %s52_s5 }
   0x9   :  { %s43_s7 = sshll.u32 %s544_s6, 4  ;;  %s545_s0 = smov [#allocation7]   ;;  %s44_s7 = int_to_ptr.vmem [resolvable:$true] %s43_s7 }
   0xa   :  { %46 = dma.hbm_to_vmem [thread:$0]  %s42_s29, 64, %s44_s7, [#allocation5]  }
   0xb   :  { %s54_s8 = sshll.u32 %s545_s0, 4  ;;  %s55_s8 = int_to_ptr.vmem [resolvable:$true] %s54_s8 }
   0xc   :  { %57 = dma.hbm_to_vmem [thread:$0]  %s53_s5, 64, %s55_s8, [#allocation8]  }
   0xd   :  { %534 = dma.done.wait [#allocation3], 256  }
   0xe   :  { %535 = vsyncadd [#allocation3], 4294967040 }
   0xf   :  { %536 = dma.done.wait [#allocation5], 16448  }
  0x10   :  { %537 = vsyncadd [#allocation5], 4294950848 }
  0x11   :  { %538 = dma.done.wait [#allocation8], 64  }
  0x12   :  { %539 = vsyncadd [#allocation8], 4294967232  ;;  %v136_v0 = vld [vmem:[#allocation4 + $0x1e0] sm:$0xff]  ;;  %v137_v1 = vld [vmem:[#allocation4 + $0x1e8] sm:$0xff]  ;;  %vm418_vm3 = vcmask 7168  }
  0x13   :  { %v132_v2 = vld [vmem:[#allocation4 + $0x1c0] sm:$0xff]  ;;  %214 = vmatpush.msra.mxu0 %v136_v0  ;;  %254 = vmatpush.msra.mxu2 %v137_v1  ;;  %v133_v4 = vld [vmem:[#allocation4 + $0x1c8] sm:$0xff]  ;;  %v138_v62 = vld [vmem:[#allocation4 + $0x1f0] sm:$0xff] }
  0x14   :  { %v200_v3 = vld [vmem:[#allocation4 + $0x3e0] sm:$0xff]  ;;  %v201_v5 = vld [vmem:[#allocation4 + $0x3e8] sm:$0xff]  ;;  %v139_v63 = vld [vmem:[#allocation4 + $0x1f8] sm:$0xff] }
  0x15   :  { %234 = vmatpush.msra.mxu1 %v200_v3  ;;  %274 = vmatpush.msra.mxu3 %v201_v5  ;;  %v128_v6 = vld [vmem:[#allocation4 + $0x1a0] sm:$0xff]  ;;  %v129_v8 = vld [vmem:[#allocation4 + $0x1a8] sm:$0xff]  ;;  %v202_v3 = vld [vmem:[#allocation4 + $0x3f0] sm:$0xff] }
  0x16   :  { %v196_v7 = vld [vmem:[#allocation4 + $0x3c0] sm:$0xff]  ;;  %215 = vmatpush.msra.mxu0 %v132_v2  ;;  %255 = vmatpush.msra.mxu2 %v133_v4  ;;  %v197_v9 = vld [vmem:[#allocation4 + $0x3c8] sm:$0xff]  ;;  %v134_v2 = vld [vmem:[#allocation4 + $0x1d0] sm:$0xff] }
  0x17   :  { %v192_v10 = vld [vmem:[#allocation4 + $0x3a0] sm:$0xff]  ;;  %235 = vmatpush.msra.mxu1 %v196_v7  ;;  %275 = vmatpush.msra.mxu3 %v197_v9  ;;  %v125_v12 = vld [vmem:[#allocation4 + $0x188] sm:$0xff]  ;;  %v135_v4 = vld [vmem:[#allocation4 + $0x1d8] sm:$0xff] }
  0x18   :  { %v124_v11 = vld [vmem:[#allocation4 + $0x180] sm:$0xff]  ;;  %v193_v13 = vld [vmem:[#allocation4 + $0x3a8] sm:$0xff]  ;;  %216 = vmatpush.msra.mxu0 %v128_v6  ;;  %256 = vmatpush.msra.mxu2 %v129_v8  ;;  %v203_v5 = vld [vmem:[#allocation4 + $0x3f8] sm:$0xff] }
  0x19   :  { %v188_v14 = vld [vmem:[#allocation4 + $0x380] sm:$0xff]  ;;  %v189_v15 = vld [vmem:[#allocation4 + $0x388] sm:$0xff]  ;;  %236 = vmatpush.msra.mxu1 %v192_v10  ;;  %276 = vmatpush.msra.mxu3 %v193_v13  ;;  %v130_v6 = vld [vmem:[#allocation4 + $0x1b0] sm:$0xff] }
  0x1a   :  { %v120_v16 = vld [vmem:[#allocation4 + $0x160] sm:$0xff]  ;;  %v121_v17 = vld [vmem:[#allocation4 + $0x168] sm:$0xff]  ;;  %217 = vmatpush.msra.mxu0 %v124_v11  ;;  %257 = vmatpush.msra.mxu2 %v125_v12  ;;  %v198_v7 = vld [vmem:[#allocation4 + $0x3d0] sm:$0xff] }
  0x1b   :  { %v184_v18 = vld [vmem:[#allocation4 + $0x360] sm:$0xff]  ;;  %v185_v19 = vld [vmem:[#allocation4 + $0x368] sm:$0xff]  ;;  %237 = vmatpush.msra.mxu1 %v188_v14  ;;  %277 = vmatpush.msra.mxu3 %v189_v15  ;;  %v131_v8 = vld [vmem:[#allocation4 + $0x1b8] sm:$0xff] }
  0x1c   :  { %v116_v20 = vld [vmem:[#allocation4 + $0x140] sm:$0xff]  ;;  %v117_v21 = vld [vmem:[#allocation4 + $0x148] sm:$0xff]  ;;  %218 = vmatpush.msra.mxu0 %v120_v16  ;;  %258 = vmatpush.msra.mxu2 %v121_v17  ;;  %v199_v9 = vld [vmem:[#allocation4 + $0x3d8] sm:$0xff] }
  0x1d   :  { %v180_v22 = vld [vmem:[#allocation4 + $0x340] sm:$0xff]  ;;  %v181_v23 = vld [vmem:[#allocation4 + $0x348] sm:$0xff]  ;;  %238 = vmatpush.msra.mxu1 %v184_v18  ;;  %278 = vmatpush.msra.mxu3 %v185_v19  ;;  %v126_v10 = vld [vmem:[#allocation4 + $0x190] sm:$0xff] }
  0x1e   :  { %v112_v24 = vld [vmem:[#allocation4 + $0x120] sm:$0xff]  ;;  %v113_v25 = vld [vmem:[#allocation4 + $0x128] sm:$0xff]  ;;  %219 = vmatpush.msra.mxu0 %v116_v20  ;;  %259 = vmatpush.msra.mxu2 %v117_v21  ;;  %v194_v11 = vld [vmem:[#allocation4 + $0x3b0] sm:$0xff] }
  0x1f   :  { %v176_v26 = vld [vmem:[#allocation4 + $0x320] sm:$0xff]  ;;  %v177_v27 = vld [vmem:[#allocation4 + $0x328] sm:$0xff]  ;;  %239 = vmatpush.msra.mxu1 %v180_v22  ;;  %279 = vmatpush.msra.mxu3 %v181_v23  ;;  %v127_v12 = vld [vmem:[#allocation4 + $0x198] sm:$0xff] }
  0x20   :  { %v108_v28 = vld [vmem:[#allocation4 + $0x100] sm:$0xff]  ;;  %v109_v29 = vld [vmem:[#allocation4 + $0x108] sm:$0xff]  ;;  %220 = vmatpush.msra.mxu0 %v112_v24  ;;  %260 = vmatpush.msra.mxu2 %v113_v25  ;;  %v195_v13 = vld [vmem:[#allocation4 + $0x3b8] sm:$0xff] }
  0x21   :  { %v172_v30 = vld [vmem:[#allocation4 + $0x300] sm:$0xff]  ;;  %v173_v31 = vld [vmem:[#allocation4 + $0x308] sm:$0xff]  ;;  %240 = vmatpush.msra.mxu1 %v176_v26  ;;  %280 = vmatpush.msra.mxu3 %v177_v27  ;;  %v122_v14 = vld [vmem:[#allocation4 + $0x170] sm:$0xff] }
  0x22   :  { %v104_v32 = vld [vmem:[#allocation4 + $0xe0] sm:$0xff]  ;;  %v105_v33 = vld [vmem:[#allocation4 + $0xe8] sm:$0xff]  ;;  %221 = vmatpush.msra.mxu0 %v108_v28  ;;  %261 = vmatpush.msra.mxu2 %v109_v29  ;;  %v190_v15 = vld [vmem:[#allocation4 + $0x390] sm:$0xff] }
  0x23   :  { %v168_v34 = vld [vmem:[#allocation4 + $0x2e0] sm:$0xff]  ;;  %v169_v35 = vld [vmem:[#allocation4 + $0x2e8] sm:$0xff]  ;;  %241 = vmatpush.msra.mxu1 %v172_v30  ;;  %281 = vmatpush.msra.mxu3 %v173_v31  ;;  %v123_v16 = vld [vmem:[#allocation4 + $0x178] sm:$0xff] }
  0x24   :  { %v100_v36 = vld [vmem:[#allocation4 + $0xc0] sm:$0xff]  ;;  %v101_v37 = vld [vmem:[#allocation4 + $0xc8] sm:$0xff]  ;;  %222 = vmatpush.msra.mxu0 %v104_v32  ;;  %262 = vmatpush.msra.mxu2 %v105_v33  ;;  %v191_v17 = vld [vmem:[#allocation4 + $0x398] sm:$0xff] }
  0x25   :  { %v164_v38 = vld [vmem:[#allocation4 + $0x2c0] sm:$0xff]  ;;  %v165_v39 = vld [vmem:[#allocation4 + $0x2c8] sm:$0xff]  ;;  %242 = vmatpush.msra.mxu1 %v168_v34  ;;  %282 = vmatpush.msra.mxu3 %v169_v35  ;;  %v118_v18 = vld [vmem:[#allocation4 + $0x150] sm:$0xff] }
  0x26   :  { %v96_v40 = vld [vmem:[#allocation4 + $0xa0] sm:$0xff]  ;;  %v97_v41 = vld [vmem:[#allocation4 + $0xa8] sm:$0xff]  ;;  %223 = vmatpush.msra.mxu0 %v100_v36  ;;  %263 = vmatpush.msra.mxu2 %v101_v37  ;;  %v186_v19 = vld [vmem:[#allocation4 + $0x370] sm:$0xff] }
  0x27   :  { %v160_v42 = vld [vmem:[#allocation4 + $0x2a0] sm:$0xff]  ;;  %v161_v43 = vld [vmem:[#allocation4 + $0x2a8] sm:$0xff]  ;;  %243 = vmatpush.msra.mxu1 %v164_v38  ;;  %283 = vmatpush.msra.mxu3 %v165_v39  ;;  %v119_v20 = vld [vmem:[#allocation4 + $0x158] sm:$0xff] }
  0x28   :  { %v92_v44 = vld [vmem:[#allocation4 + $0x80] sm:$0xff]  ;;  %v93_v45 = vld [vmem:[#allocation4 + $0x88] sm:$0xff]  ;;  %224 = vmatpush.msra.mxu0 %v96_v40  ;;  %264 = vmatpush.msra.mxu2 %v97_v41  ;;  %v187_v21 = vld [vmem:[#allocation4 + $0x378] sm:$0xff] }
  0x29   :  { %v156_v46 = vld [vmem:[#allocation4 + $0x280] sm:$0xff]  ;;  %v157_v47 = vld [vmem:[#allocation4 + $0x288] sm:$0xff]  ;;  %244 = vmatpush.msra.mxu1 %v160_v42  ;;  %284 = vmatpush.msra.mxu3 %v161_v43  ;;  %v114_v22 = vld [vmem:[#allocation4 + $0x130] sm:$0xff] }
  0x2a   :  { %v88_v48 = vld [vmem:[#allocation4 + $0x60] sm:$0xff]  ;;  %v89_v49 = vld [vmem:[#allocation4 + $0x68] sm:$0xff]  ;;  %225 = vmatpush.msra.mxu0 %v92_v44  ;;  %265 = vmatpush.msra.mxu2 %v93_v45  ;;  %v182_v23 = vld [vmem:[#allocation4 + $0x350] sm:$0xff] }
  0x2b   :  { %v152_v50 = vld [vmem:[#allocation4 + $0x260] sm:$0xff]  ;;  %v153_v51 = vld [vmem:[#allocation4 + $0x268] sm:$0xff]  ;;  %245 = vmatpush.msra.mxu1 %v156_v46  ;;  %285 = vmatpush.msra.mxu3 %v157_v47  ;;  %v115_v24 = vld [vmem:[#allocation4 + $0x138] sm:$0xff] }
  0x2c   :  { %v84_v52 = vld [vmem:[#allocation4 + $0x40] sm:$0xff]  ;;  %v85_v53 = vld [vmem:[#allocation4 + $0x48] sm:$0xff]  ;;  %226 = vmatpush.msra.mxu0 %v88_v48  ;;  %266 = vmatpush.msra.mxu2 %v89_v49  ;;  %v183_v25 = vld [vmem:[#allocation4 + $0x358] sm:$0xff] }
  0x2d   :  { %v148_v54 = vld [vmem:[#allocation4 + $0x240] sm:$0xff]  ;;  %v149_v55 = vld [vmem:[#allocation4 + $0x248] sm:$0xff]  ;;  %246 = vmatpush.msra.mxu1 %v152_v50  ;;  %286 = vmatpush.msra.mxu3 %v153_v51  ;;  %v110_v26 = vld [vmem:[#allocation4 + $0x110] sm:$0xff] }
  0x2e   :  { %v80_v56 = vld [vmem:[#allocation4 + $0x20] sm:$0xff]  ;;  %v81_v57 = vld [vmem:[#allocation4 + $0x28] sm:$0xff]  ;;  %227 = vmatpush.msra.mxu0 %v84_v52  ;;  %267 = vmatpush.msra.mxu2 %v85_v53  ;;  %v178_v27 = vld [vmem:[#allocation4 + $0x330] sm:$0xff] }
  0x2f   :  { %v144_v58 = vld [vmem:[#allocation4 + $0x220] sm:$0xff]  ;;  %v145_v59 = vld [vmem:[#allocation4 + $0x228] sm:$0xff]  ;;  %247 = vmatpush.msra.mxu1 %v148_v54  ;;  %287 = vmatpush.msra.mxu3 %v149_v55  ;;  %v111_v28 = vld [vmem:[#allocation4 + $0x118] sm:$0xff] }
  0x30   :  { %v76_v60 = vld [vmem:[#allocation4] sm:$0xff]  ;;  %v77_v61 = vld [vmem:[#allocation4 + $0x8] sm:$0xff]  ;;  %228 = vmatpush.msra.mxu0 %v80_v56  ;;  %268 = vmatpush.msra.mxu2 %v81_v57  ;;  %v179_v29 = vld [vmem:[#allocation4 + $0x338] sm:$0xff] }
  0x31   :  { %248 = vmatpush.msra.mxu1 %v144_v58  ;;  %288 = vmatpush.msra.mxu3 %v145_v59  ;;  %v140_v0 = vld [vmem:[#allocation4 + $0x200] sm:$0xff]  ;;  %v141_v1 = vld [vmem:[#allocation4 + $0x208] sm:$0xff]  ;;  %v106_v30 = vld [vmem:[#allocation4 + $0xf0] sm:$0xff] }
  0x32   :  { %229 = vmatpush.msra.mxu0 %v76_v60  ;;  %269 = vmatpush.msra.mxu2 %v77_v61  ;;  %v174_v31 = vld [vmem:[#allocation4 + $0x310] sm:$0xff]  ;;  %v107_v32 = vld [vmem:[#allocation4 + $0xf8] sm:$0xff] }
  0x33   :  { %249 = vmatpush.msra.mxu1 %v140_v0  ;;  %289 = vmatpush.msra.mxu3 %v141_v1  ;;  %v175_v33 = vld [vmem:[#allocation4 + $0x318] sm:$0xff]  ;;  %v102_v34 = vld [vmem:[#allocation4 + $0xd0] sm:$0xff] }
  0x34   :  { %294 = vmatpush.msrb.mxu0 %v138_v62  ;;  %334 = vmatpush.msrb.mxu2 %v139_v63  ;;  %v170_v35 = vld [vmem:[#allocation4 + $0x2f0] sm:$0xff]  ;;  %v103_v36 = vld [vmem:[#allocation4 + $0xd8] sm:$0xff] }
  0x35   :  { %314 = vmatpush.msrb.mxu1 %v202_v3  ;;  %354 = vmatpush.msrb.mxu3 %v203_v5  ;;  %v171_v37 = vld [vmem:[#allocation4 + $0x2f8] sm:$0xff]  ;;  %v98_v38 = vld [vmem:[#allocation4 + $0xb0] sm:$0xff] }
  0x36   :  { %295 = vmatpush.msrb.mxu0 %v134_v2  ;;  %335 = vmatpush.msrb.mxu2 %v135_v4  ;;  %v166_v39 = vld [vmem:[#allocation4 + $0x2d0] sm:$0xff]  ;;  %v99_v40 = vld [vmem:[#allocation4 + $0xb8] sm:$0xff]  ;;  %v204_v2 = vld [vmem:[#allocation6] sm:$0xf] }
  0x37   :  { %315 = vmatpush.msrb.mxu1 %v198_v7  ;;  %355 = vmatpush.msrb.mxu3 %v199_v9  ;;  %v167_v41 = vld [vmem:[#allocation4 + $0x2d8] sm:$0xff]  ;;  %v74_v42 = vld [vmem:[#allocation2] sm:$0xff]  ;;  %v206_v4 = vperm.slane %v204_v2, 0  ;;  %v207_v5 = vperm.slane %v204_v2, 1 }
  0x38   :  { %296 = vmatpush.msrb.mxu0 %v130_v6  ;;  %336 = vmatpush.msrb.mxu2 %v131_v8  ;;  %v94_v43 = vld [vmem:[#allocation4 + $0x90] sm:$0xff]  ;;  %v95_v45 = vld [vmem:[#allocation4 + $0x98] sm:$0xff] }
  0x39   :  { %316 = vmatpush.msrb.mxu1 %v194_v11  ;;  %356 = vmatpush.msrb.mxu3 %v195_v13  ;;  %v162_v44 = vld [vmem:[#allocation4 + $0x2b0] sm:$0xff]  ;;  %v163_v46 = vld [vmem:[#allocation4 + $0x2b8] sm:$0xff]  ;;  %v208_v11 = vperm.slane %v204_v2, 2  ;;  %v378_v13 = vld [vmem:[#allocation7] sm:$0xf] }
  0x3a   :  { %297 = vmatpush.msrb.mxu0 %v126_v10  ;;  %337 = vmatpush.msrb.mxu2 %v127_v12  ;;  %v75_v47 = vld [vmem:[#allocation2 + $0x8] sm:$0xff]  ;;  %v90_v48 = vld [vmem:[#allocation4 + $0x70] sm:$0xff] }
  0x3b   :  { %317 = vmatpush.msrb.mxu1 %v190_v15  ;;  %357 = vmatpush.msrb.mxu3 %v191_v17  ;;  %v158_v49 = vld [vmem:[#allocation4 + $0x290] sm:$0xff]  ;;  %v91_v50 = vld [vmem:[#allocation4 + $0x78] sm:$0xff]  ;;  %v380_v17 = vperm.slane %v378_v13, 0 }
  0x3c   :  { %298 = vmatpush.msrb.mxu0 %v122_v14  ;;  %338 = vmatpush.msrb.mxu2 %v123_v16  ;;  %v159_v51 = vld [vmem:[#allocation4 + $0x298] sm:$0xff]  ;;  %v86_v52 = vld [vmem:[#allocation4 + $0x50] sm:$0xff] }
  0x3d   :  { %318 = vmatpush.msrb.mxu1 %v186_v19  ;;  %358 = vmatpush.msrb.mxu3 %v187_v21  ;;  %v154_v53 = vld [vmem:[#allocation4 + $0x270] sm:$0xff]  ;;  %v87_v54 = vld [vmem:[#allocation4 + $0x58] sm:$0xff] }
  0x3e   :  { %299 = vmatpush.msrb.mxu0 %v118_v18  ;;  %339 = vmatpush.msrb.mxu2 %v119_v20  ;;  %v155_v55 = vld [vmem:[#allocation4 + $0x278] sm:$0xff]  ;;  %v82_v56 = vld [vmem:[#allocation4 + $0x30] sm:$0xff]  ;;  %v381_v18 = vperm.slane %v378_v13, 1 }
  0x3f   :  { %319 = vmatpush.msrb.mxu1 %v182_v23  ;;  %359 = vmatpush.msrb.mxu3 %v183_v25  ;;  %v150_v57 = vld [vmem:[#allocation4 + $0x250] sm:$0xff]  ;;  %v83_v58 = vld [vmem:[#allocation4 + $0x38] sm:$0xff]  ;;  %v209_v23 = vperm.slane %v204_v2, 3  ;;  %v382_v25 = vperm.slane %v378_v13, 2 }
  0x40   :  { %300 = vmatpush.msrb.mxu0 %v114_v22  ;;  %340 = vmatpush.msrb.mxu2 %v115_v24  ;;  %v151_v59 = vld [vmem:[#allocation4 + $0x258] sm:$0xff]  ;;  %v78_v60 = vld [vmem:[#allocation4 + $0x10] sm:$0xff] }
  0x41   :  { %320 = vmatpush.msrb.mxu1 %v178_v27  ;;  %360 = vmatpush.msrb.mxu3 %v179_v29  ;;  %v146_v61 = vld [vmem:[#allocation4 + $0x230] sm:$0xff]  ;;  %v79_v62 = vld [vmem:[#allocation4 + $0x18] sm:$0xff] }
  0x42   :  { %301 = vmatpush.msrb.mxu0 %v110_v26  ;;  %341 = vmatpush.msrb.mxu2 %v111_v28  ;;  %v147_v63 = vld [vmem:[#allocation4 + $0x238] sm:$0xff]  ;;  %v142_v0 = vld [vmem:[#allocation4 + $0x210] sm:$0xff] }
  0x43   :  { %321 = vmatpush.msrb.mxu1 %v174_v31  ;;  %361 = vmatpush.msrb.mxu3 %v175_v33  ;;  %v143_v1 = vld [vmem:[#allocation4 + $0x218] sm:$0xff]  ;;  %v383_v33 = vperm.slane %v378_v13, 3 }
  0x44   :  { %302 = vmatpush.msrb.mxu0 %v106_v30  ;;  %342 = vmatpush.msrb.mxu2 %v107_v32 }
  0x45   :  { %322 = vmatpush.msrb.mxu1 %v170_v35  ;;  %362 = vmatpush.msrb.mxu3 %v171_v37 }
  0x46   :  { %303 = vmatpush.msrb.mxu0 %v102_v34  ;;  %343 = vmatpush.msrb.mxu2 %v103_v36 }
  0x47   :  { %323 = vmatpush.msrb.mxu1 %v166_v39  ;;  %363 = vmatpush.msrb.mxu3 %v167_v41 }
  0x48   :  { %304 = vmatpush.msrb.mxu0 %v98_v38  ;;  %344 = vmatpush.msrb.mxu2 %v99_v40 }
  0x49   :  { %270 = vmatmul.f32.vlgmr.msra.gmra.mxu2 %v74_v42  ;;  %324 = vmatpush.msrb.mxu1 %v162_v44 }
  0x4a   :  { %305 = vmatpush.msrb.mxu0 %v94_v43  ;;  %345 = vmatpush.msrb.mxu2 %v95_v45 }
  0x4b   :  { %364 = vmatpush.msrb.mxu3 %v163_v46  ;;  %230 = vmatmul.f32.vlgmr.msra.gmra.mxu0 %v74_v42 }
  0x4c   :  { %290 = vmatmul.f32.vlgmr.msra.gmra.mxu3 %v75_v47  ;;  %306 = vmatpush.msrb.mxu0 %v90_v48 }
  0x4d   :  { %325 = vmatpush.msrb.mxu1 %v158_v49  ;;  %346 = vmatpush.msrb.mxu2 %v91_v50 }
  0x4e   :  { %365 = vmatpush.msrb.mxu3 %v159_v51  ;;  %250 = vmatmul.f32.vlgmr.msra.gmra.mxu1 %v75_v47 }
  0x4f   :  { %307 = vmatpush.msrb.mxu0 %v86_v52  ;;  %326 = vmatpush.msrb.mxu1 %v154_v53 }
  0x50   :  { %347 = vmatpush.msrb.mxu2 %v87_v54  ;;  %366 = vmatpush.msrb.mxu3 %v155_v55 }
  0x51   :  { %308 = vmatpush.msrb.mxu0 %v82_v56  ;;  %327 = vmatpush.msrb.mxu1 %v150_v57 }
  0x52   :  { %348 = vmatpush.msrb.mxu2 %v83_v58  ;;  %367 = vmatpush.msrb.mxu3 %v151_v59 }
  0x53   :  { %309 = vmatpush.msrb.mxu0 %v78_v60  ;;  %328 = vmatpush.msrb.mxu1 %v146_v61 }
  0x54   :  { %349 = vmatpush.msrb.mxu2 %v79_v62  ;;  %368 = vmatpush.msrb.mxu3 %v147_v63 }
  0x55   :  { %310 = vmatmul.f32.vlgmr.msrb.gmra.mxu0 %v74_v42  ;;  %350 = vmatmul.f32.vlgmr.msrb.gmra.mxu2 %v74_v42 }
  0x56   :  { %329 = vmatpush.msrb.mxu1 %v142_v0  ;;  %369 = vmatpush.msrb.mxu3 %v143_v1 }
  0x57   :  { %330 = vmatmul.f32.vlgmr.msrb.gmra.mxu1 %v75_v47  ;;  %370 = vmatmul.f32.vlgmr.msrb.gmra.mxu3 %v75_v47 }
  0xc8   :  { %v231_v3 = vpop.f32.mrf.mxu0 }
  0xc9   :  { %v232_v8 = vadd.f32 %v231_v3, %v206_v4 }
  0xcb   :  { %v251_v6 = vpop.f32.mrf.mxu1 }
  0xcc   :  { %v271_v7 = vpop.f32.mrf.mxu2  ;;  %v252_v12 = vadd.f32 %v251_v6, %v232_v8 }
  0xcd   :  { %v272_v9 = vadd.f32 %v271_v7, %v207_v5 }
  0xce   :  { %v374_v20 = vmax.f32 %v252_v12, 0.0 }
  0xcf   :  { %v291_v10 = vpop.f32.mrf.mxu3 }
  0xd0   :  { %v292_v14 = vadd.f32 %v291_v10, %v272_v9  ;;  %v388_v27 = vmul.f32 %v380_v17, %v374_v20 }
  0xd2   :  { %v311_v15 = vpop.f32.mrf.mxu0  ;;  %v375_v21 = vmax.f32 %v292_v14, 0.0 }
  0xd3   :  { %v312_v16 = vadd.f32 %v311_v15, %v208_v11 }
  0xd4   :  { %v331_v19 = vpop.f32.mrf.mxu1  ;;  %v389_v28 = vmul.f32 %v381_v18, %v375_v21 }
  0xd5   :  { %v332_v22 = vadd.f32 %v331_v19, %v312_v16 }
  0xd6   :  { %v392_v35 = vadd.f32 %v389_v28, %v388_v27 }
  0xd7   :  { %v376_v24 = vmax.f32 %v332_v22, 0.0 }
  0xd8   :  { %v351_v26 = vpop.f32.mrf.mxu2 }
  0xd9   :  { %v352_v29 = vadd.f32 %v351_v26, %v209_v23  ;;  %v390_v31 = vmul.f32 %v382_v25, %v376_v24 }
  0xda   :  { %v371_v30 = vpop.f32.mrf.mxu3 }
  0xdb   :  { %v372_v32 = vadd.f32 %v371_v30, %v352_v29  ;;  %v393_v37 = vadd.f32 %v392_v35, %v390_v31 }
  0xdd   :  { %v377_v34 = vmax.f32 %v372_v32, 0.0 }
  0xdf   :  { %v391_v36 = vmul.f32 %v383_v33, %v377_v34 }
  0xe1   :  { %v394_v38 = vadd.f32 %v393_v37, %v391_v36 }
  0xe3   :  { %395 = vadd.xlane.f32.xlu0 %v394_v38 }
 0x156   :  { %v396_v39 = vpop.xlane.xlu0 %395 }
 0x157   :  { %v427_v40 = vclamps-f32 %v396_v39, 60.0 }
 0x159   :  { %v399_v41 = vsub.f32 0.0, %v427_v40 }
 0x15b   :  { %v400_v42 = vmul.f32 1.442695, %v399_v41 }
 0x15d   :  { %434 = vpow2.f32 %v400_v42 }
 0x163   :  { %v435_v43 = vpop.eup %434 }
 0x164   :  { %v402_v44 = vadd.f32 1.0, %v435_v43 }
 0x166   :  { %436 = vrcp.f32 %v402_v44  ;;  %v414_v48 = vand.u32 2147483648, %v402_v44  ;;  %v412_v50 = vand.u32 2147483647, %v402_v44  ;;  %vm408_vm1 = vweird.f32 %v402_v44 }
 0x168   :  { %v415_v52 = vor.u32 1.1754944e-38, %v414_v48  ;;  %vm413_vm4 = vcmp.eq.f32.partialorder %v412_v50, 8.507059e+37 }
 0x16c   :  { %v437_v45 = vpop.eup %436 }
 0x16d   :  { %v404_v46 = vmul.f32 %v437_v45, %v402_v44  ;;  %vm409_vm0 = vweird.f32 %v437_v45 }
 0x16e   :  { %vm410_vm2 = vmor %vm408_vm1, %vm409_vm0 }
 0x16f   :  { %v405_v47 = vsub.f32 1.0, %v404_v46 }
 0x171   :  { %v406_v49 = vmul.f32 %v437_v45, %v405_v47 }
 0x173   :  { %v407_v51 = vadd.f32 %v437_v45, %v406_v49 }
 0x175   :  { %v411_v53 = vsel %vm410_vm2, %v437_v45, %v407_v51 }
 0x176   :  { %v416_v54 = vsel %vm413_vm4, %v415_v52, %v411_v53 }
 0x177   :  { %419 = vst.msk [vmem:[%s590_s4] sm:$0xff] %vm418_vm3, %v416_v54 }
 0x178   :  { %424 = vsyncpa [#allocation3], 1 }
 0x179   :  { %425 = vsyncpa [#allocation5], 1 }
 0x17a   :  { %426 = vsyncpa [#allocation8], 1 }

// kernel: tpu_custom_call.1
= control target key start
LH: loop header
LB: loop body
LE: loop exit
PB: predicated region body
PF: predicated region fallthrough
CT: control target
= control target key end

     0   :  { %9 = vsyncpa [#allocation3], 0  ;;  %s586_s0 = inlined_call_operand.hbm [shape: f32[8,256], index: 0, kind: input, shape index: {}]   ;;  %s587_s1 = inlined_call_operand.hbm [shape: f32[256,512], index: 1, kind: input, shape index: {}]   ;;  %s588_s2 = inlined_call_operand.hbm [shape: f32[1,512], index: 2, kind: input, shape index: {}]   ;;  %s589_s3 = inlined_call_operand.hbm [shape: f32[1,512], index: 3, kind: input, shape index: {}]   ;;  %s590_s4 = inlined_call_operand.vmem [shape: f32[8,1], index: 4, kind: output, shape index: {}]  }
   0x1   :  { %10 = vsyncpa [#allocation5], 0  ;;  %s27_s17 = sshll.u32 %s587_s1, 4  ;;  %s28_s17 = int_to_ptr.hbm [resolvable:$true] %s27_s17 }
   0x2   :  { %11 = vsyncpa [#allocation8], 0  ;;  %s540_s18 = smov [#allocation4]   ;;  %s17_s22 = sshll.u32 %s586_s0, 4  ;;  %s18_s22 = int_to_ptr.hbm [resolvable:$true] %s17_s22 }
   0x3   :  { %s29_s19 = sshll.u32 %s540_s18, 4  ;;  %s541_s23 = smov 512   ;;  %s30_s19 = int_to_ptr.vmem [resolvable:$true] %s29_s19 }
   0x4   :  { %s542_s24 = smov 32   ;;  %s543_s25 = smov [#allocation2]  }
   0x5   :  { %35 = dma.hbm_to_vmem [thread:$0]  %s28_s17, 16384, %s30_s19, [#allocation5], %s541_s23, %s541_s23, %s542_s24  }
   0x6   :  { %s19_s26 = sshll.u32 %s543_s25, 4  ;;  %s41_s29 = sshll.u32 %s588_s2, 4  ;;  %s20_s26 = int_to_ptr.vmem [resolvable:$true] %s19_s26  ;;  %s42_s29 = int_to_ptr.hbm [resolvable:$true] %s41_s29 }
   0x7   :  { %22 = dma.hbm_to_vmem [thread:$0]  %s18_s22, 256, %s20_s26, [#allocation3]  }
   0x8   :  { %s52_s5 = sshll.u32 %s589_s3, 4  ;;  %s544_s6 = smov [#allocation6]   ;;  %s53_s5 = int_to_ptr.hbm [resolvable:$true] %s52_s5 }
   0x9   :  { %s43_s7 = sshll.u32 %s544_s6, 4  ;;  %s545_s0 = smov [#allocation7]   ;;  %s44_s7 = int_to_ptr.vmem [resolvable:$true] %s43_s7 }
   0xa   :  { %46 = dma.hbm_to_vmem [thread:$0]  %s42_s29, 64, %s44_s7, [#allocation5]  }
   0xb   :  { %s54_s8 = sshll.u32 %s545_s0, 4  ;;  %s55_s8 = int_to_ptr.vmem [resolvable:$true] %s54_s8 }
   0xc   :  { %57 = dma.hbm_to_vmem [thread:$0]  %s53_s5, 64, %s55_s8, [#allocation8]  }
   0xd   :  { %534 = dma.done.wait [#allocation3], 256  }
   0xe   :  { %535 = vsyncadd [#allocation3], 4294967040 }
   0xf   :  { %536 = dma.done.wait [#allocation5], 16448  }
  0x10   :  { %537 = vsyncadd [#allocation5], 4294950848 }
  0x11   :  { %538 = dma.done.wait [#allocation8], 64  }
  0x12   :  { %539 = vsyncadd [#allocation8], 4294967232  ;;  %v136_v0 = vld [vmem:[#allocation4 + $0x1e0] sm:$0xff]  ;;  %v137_v1 = vld [vmem:[#allocation4 + $0x1e8] sm:$0xff]  ;;  %vm418_vm3 = vcmask 7168  }
  0x13   :  { %v132_v2 = vld [vmem:[#allocation4 + $0x1c0] sm:$0xff]  ;;  %214 = vmatpush.msra.mxu0 %v136_v0  ;;  %254 = vmatpush.msra.mxu2 %v137_v1  ;;  %v133_v4 = vld [vmem:[#allocation4 + $0x1c8] sm:$0xff]  ;;  %v138_v62 = vld [vmem:[#allocation4 + $0x1f0] sm:$0xff] }
  0x14   :  { %v200_v3 = vld [vmem:[#allocation4 + $0x3e0] sm:$0xff]  ;;  %v201_v5 = vld [vmem:[#allocation4 + $0x3e8] sm:$0xff]  ;;  %v139_v63 = vld [vmem:[#allocation4 + $0x1f8] sm:$0xff] }
  0x15   :  { %234 = vmatpush.msra.mxu1 %v200_v3  ;;  %274 = vmatpush.msra.mxu3 %v201_v5  ;;  %v128_v6 = vld [vmem:[#allocation4 + $0x1a0] sm:$0xff]  ;;  %v129_v8 = vld [vmem:[#allocation4 + $0x1a8] sm:$0xff]  ;;  %v202_v3 = vld [vmem:[#allocation4 + $0x3f0] sm:$0xff] }
  0x16   :  { %v196_v7 = vld [vmem:[#allocation4 + $0x3c0] sm:$0xff]  ;;  %215 = vmatpush.msra.mxu0 %v132_v2  ;;  %255 = vmatpush.msra.mxu2 %v133_v4  ;;  %v197_v9 = vld [vmem:[#allocation4 + $0x3c8] sm:$0xff]  ;;  %v134_v2 = vld [vmem:[#allocation4 + $0x1d0] sm:$0xff] }
  0x17   :  { %v192_v10 = vld [vmem:[#allocation4 + $0x3a0] sm:$0xff]  ;;  %235 = vmatpush.msra.mxu1 %v196_v7  ;;  %275 = vmatpush.msra.mxu3 %v197_v9  ;;  %v125_v12 = vld [vmem:[#allocation4 + $0x188] sm:$0xff]  ;;  %v135_v4 = vld [vmem:[#allocation4 + $0x1d8] sm:$0xff] }
  0x18   :  { %v124_v11 = vld [vmem:[#allocation4 + $0x180] sm:$0xff]  ;;  %v193_v13 = vld [vmem:[#allocation4 + $0x3a8] sm:$0xff]  ;;  %216 = vmatpush.msra.mxu0 %v128_v6  ;;  %256 = vmatpush.msra.mxu2 %v129_v8  ;;  %v203_v5 = vld [vmem:[#allocation4 + $0x3f8] sm:$0xff] }
  0x19   :  { %v188_v14 = vld [vmem:[#allocation4 + $0x380] sm:$0xff]  ;;  %v189_v15 = vld [vmem:[#allocation4 + $0x388] sm:$0xff]  ;;  %236 = vmatpush.msra.mxu1 %v192_v10  ;;  %276 = vmatpush.msra.mxu3 %v193_v13  ;;  %v130_v6 = vld [vmem:[#allocation4 + $0x1b0] sm:$0xff] }
  0x1a   :  { %v120_v16 = vld [vmem:[#allocation4 + $0x160] sm:$0xff]  ;;  %v121_v17 = vld [vmem:[#allocation4 + $0x168] sm:$0xff]  ;;  %217 = vmatpush.msra.mxu0 %v124_v11  ;;  %257 = vmatpush.msra.mxu2 %v125_v12  ;;  %v198_v7 = vld [vmem:[#allocation4 + $0x3d0] sm:$0xff] }
  0x1b   :  { %v184_v18 = vld [vmem:[#allocation4 + $0x360] sm:$0xff]  ;;  %v185_v19 = vld [vmem:[#allocation4 + $0x368] sm:$0xff]  ;;  %237 = vmatpush.msra.mxu1 %v188_v14  ;;  %277 = vmatpush.msra.mxu3 %v189_v15  ;;  %v131_v8 = vld [vmem:[#allocation4 + $0x1b8] sm:$0xff] }
  0x1c   :  { %v116_v20 = vld [vmem:[#allocation4 + $0x140] sm:$0xff]  ;;  %v117_v21 = vld [vmem:[#allocation4 + $0x148] sm:$0xff]  ;;  %218 = vmatpush.msra.mxu0 %v120_v16  ;;  %258 = vmatpush.msra.mxu2 %v121_v17  ;;  %v199_v9 = vld [vmem:[#allocation4 + $0x3d8] sm:$0xff] }
  0x1d   :  { %v180_v22 = vld [vmem:[#allocation4 + $0x340] sm:$0xff]  ;;  %v181_v23 = vld [vmem:[#allocation4 + $0x348] sm:$0xff]  ;;  %238 = vmatpush.msra.mxu1 %v184_v18  ;;  %278 = vmatpush.msra.mxu3 %v185_v19  ;;  %v126_v10 = vld [vmem:[#allocation4 + $0x190] sm:$0xff] }
  0x1e   :  { %v112_v24 = vld [vmem:[#allocation4 + $0x120] sm:$0xff]  ;;  %v113_v25 = vld [vmem:[#allocation4 + $0x128] sm:$0xff]  ;;  %219 = vmatpush.msra.mxu0 %v116_v20  ;;  %259 = vmatpush.msra.mxu2 %v117_v21  ;;  %v194_v11 = vld [vmem:[#allocation4 + $0x3b0] sm:$0xff] }
  0x1f   :  { %v176_v26 = vld [vmem:[#allocation4 + $0x320] sm:$0xff]  ;;  %v177_v27 = vld [vmem:[#allocation4 + $0x328] sm:$0xff]  ;;  %239 = vmatpush.msra.mxu1 %v180_v22  ;;  %279 = vmatpush.msra.mxu3 %v181_v23  ;;  %v127_v12 = vld [vmem:[#allocation4 + $0x198] sm:$0xff] }
  0x20   :  { %v108_v28 = vld [vmem:[#allocation4 + $0x100] sm:$0xff]  ;;  %v109_v29 = vld [vmem:[#allocation4 + $0x108] sm:$0xff]  ;;  %220 = vmatpush.msra.mxu0 %v112_v24  ;;  %260 = vmatpush.msra.mxu2 %v113_v25  ;;  %v195_v13 = vld [vmem:[#allocation4 + $0x3b8] sm:$0xff] }
  0x21   :  { %v172_v30 = vld [vmem:[#allocation4 + $0x300] sm:$0xff]  ;;  %v173_v31 = vld [vmem:[#allocation4 + $0x308] sm:$0xff]  ;;  %240 = vmatpush.msra.mxu1 %v176_v26  ;;  %280 = vmatpush.msra.mxu3 %v177_v27  ;;  %v122_v14 = vld [vmem:[#allocation4 + $0x170] sm:$0xff] }
  0x22   :  { %v104_v32 = vld [vmem:[#allocation4 + $0xe0] sm:$0xff]  ;;  %v105_v33 = vld [vmem:[#allocation4 + $0xe8] sm:$0xff]  ;;  %221 = vmatpush.msra.mxu0 %v108_v28  ;;  %261 = vmatpush.msra.mxu2 %v109_v29  ;;  %v190_v15 = vld [vmem:[#allocation4 + $0x390] sm:$0xff] }
  0x23   :  { %v168_v34 = vld [vmem:[#allocation4 + $0x2e0] sm:$0xff]  ;;  %v169_v35 = vld [vmem:[#allocation4 + $0x2e8] sm:$0xff]  ;;  %241 = vmatpush.msra.mxu1 %v172_v30  ;;  %281 = vmatpush.msra.mxu3 %v173_v31  ;;  %v123_v16 = vld [vmem:[#allocation4 + $0x178] sm:$0xff] }
  0x24   :  { %v100_v36 = vld [vmem:[#allocation4 + $0xc0] sm:$0xff]  ;;  %v101_v37 = vld [vmem:[#allocation4 + $0xc8] sm:$0xff]  ;;  %222 = vmatpush.msra.mxu0 %v104_v32  ;;  %262 = vmatpush.msra.mxu2 %v105_v33  ;;  %v191_v17 = vld [vmem:[#allocation4 + $0x398] sm:$0xff] }
  0x25   :  { %v164_v38 = vld [vmem:[#allocation4 + $0x2c0] sm:$0xff]  ;;  %v165_v39 = vld [vmem:[#allocation4 + $0x2c8] sm:$0xff]  ;;  %242 = vmatpush.msra.mxu1 %v168_v34  ;;  %282 = vmatpush.msra.mxu3 %v169_v35  ;;  %v118_v18 = vld [vmem:[#allocation4 + $0x150] sm:$0xff] }
  0x26   :  { %v96_v40 = vld [vmem:[#allocation4 + $0xa0] sm:$0xff]  ;;  %v97_v41 = vld [vmem:[#allocation4 + $0xa8] sm:$0xff]  ;;  %223 = vmatpush.msra.mxu0 %v100_v36  ;;  %263 = vmatpush.msra.mxu2 %v101_v37  ;;  %v186_v19 = vld [vmem:[#allocation4 + $0x370] sm:$0xff] }
  0x27   :  { %v160_v42 = vld [vmem:[#allocation4 + $0x2a0] sm:$0xff]  ;;  %v161_v43 = vld [vmem:[#allocation4 + $0x2a8] sm:$0xff]  ;;  %243 = vmatpush.msra.mxu1 %v164_v38  ;;  %283 = vmatpush.msra.mxu3 %v165_v39  ;;  %v119_v20 = vld [vmem:[#allocation4 + $0x158] sm:$0xff] }
  0x28   :  { %v92_v44 = vld [vmem:[#allocation4 + $0x80] sm:$0xff]  ;;  %v93_v45 = vld [vmem:[#allocation4 + $0x88] sm:$0xff]  ;;  %224 = vmatpush.msra.mxu0 %v96_v40  ;;  %264 = vmatpush.msra.mxu2 %v97_v41  ;;  %v187_v21 = vld [vmem:[#allocation4 + $0x378] sm:$0xff] }
  0x29   :  { %v156_v46 = vld [vmem:[#allocation4 + $0x280] sm:$0xff]  ;;  %v157_v47 = vld [vmem:[#allocation4 + $0x288] sm:$0xff]  ;;  %244 = vmatpush.msra.mxu1 %v160_v42  ;;  %284 = vmatpush.msra.mxu3 %v161_v43  ;;  %v114_v22 = vld [vmem:[#allocation4 + $0x130] sm:$0xff] }
  0x2a   :  { %v88_v48 = vld [vmem:[#allocation4 + $0x60] sm:$0xff]  ;;  %v89_v49 = vld [vmem:[#allocation4 + $0x68] sm:$0xff]  ;;  %225 = vmatpush.msra.mxu0 %v92_v44  ;;  %265 = vmatpush.msra.mxu2 %v93_v45  ;;  %v182_v23 = vld [vmem:[#allocation4 + $0x350] sm:$0xff] }
  0x2b   :  { %v152_v50 = vld [vmem:[#allocation4 + $0x260] sm:$0xff]  ;;  %v153_v51 = vld [vmem:[#allocation4 + $0x268] sm:$0xff]  ;;  %245 = vmatpush.msra.mxu1 %v156_v46  ;;  %285 = vmatpush.msra.mxu3 %v157_v47  ;;  %v115_v24 = vld [vmem:[#allocation4 + $0x138] sm:$0xff] }
  0x2c   :  { %v84_v52 = vld [vmem:[#allocation4 + $0x40] sm:$0xff]  ;;  %v85_v53 = vld [vmem:[#allocation4 + $0x48] sm:$0xff]  ;;  %226 = vmatpush.msra.mxu0 %v88_v48  ;;  %266 = vmatpush.msra.mxu2 %v89_v49  ;;  %v183_v25 = vld [vmem:[#allocation4 + $0x358] sm:$0xff] }
  0x2d   :  { %v148_v54 = vld [vmem:[#allocation4 + $0x240] sm:$0xff]  ;;  %v149_v55 = vld [vmem:[#allocation4 + $0x248] sm:$0xff]  ;;  %246 = vmatpush.msra.mxu1 %v152_v50  ;;  %286 = vmatpush.msra.mxu3 %v153_v51  ;;  %v110_v26 = vld [vmem:[#allocation4 + $0x110] sm:$0xff] }
  0x2e   :  { %v80_v56 = vld [vmem:[#allocation4 + $0x20] sm:$0xff]  ;;  %v81_v57 = vld [vmem:[#allocation4 + $0x28] sm:$0xff]  ;;  %227 = vmatpush.msra.mxu0 %v84_v52  ;;  %267 = vmatpush.msra.mxu2 %v85_v53  ;;  %v178_v27 = vld [vmem:[#allocation4 + $0x330] sm:$0xff] }
  0x2f   :  { %v144_v58 = vld [vmem:[#allocation4 + $0x220] sm:$0xff]  ;;  %v145_v59 = vld [vmem:[#allocation4 + $0x228] sm:$0xff]  ;;  %247 = vmatpush.msra.mxu1 %v148_v54  ;;  %287 = vmatpush.msra.mxu3 %v149_v55  ;;  %v111_v28 = vld [vmem:[#allocation4 + $0x118] sm:$0xff] }
  0x30   :  { %v76_v60 = vld [vmem:[#allocation4] sm:$0xff]  ;;  %v77_v61 = vld [vmem:[#allocation4 + $0x8] sm:$0xff]  ;;  %228 = vmatpush.msra.mxu0 %v80_v56  ;;  %268 = vmatpush.msra.mxu2 %v81_v57  ;;  %v179_v29 = vld [vmem:[#allocation4 + $0x338] sm:$0xff] }
  0x31   :  { %248 = vmatpush.msra.mxu1 %v144_v58  ;;  %288 = vmatpush.msra.mxu3 %v145_v59  ;;  %v140_v0 = vld [vmem:[#allocation4 + $0x200] sm:$0xff]  ;;  %v141_v1 = vld [vmem:[#allocation4 + $0x208] sm:$0xff]  ;;  %v106_v30 = vld [vmem:[#allocation4 + $0xf0] sm:$0xff] }
  0x32   :  { %229 = vmatpush.msra.mxu0 %v76_v60  ;;  %269 = vmatpush.msra.mxu2 %v77_v61  ;;  %v174_v31 = vld [vmem:[#allocation4 + $0x310] sm:$0xff]  ;;  %v107_v32 = vld [vmem:[#allocation4 + $0xf8] sm:$0xff] }
  0x33   :  { %249 = vmatpush.msra.mxu1 %v140_v0  ;;  %289 = vmatpush.msra.mxu3 %v141_v1  ;;  %v175_v33 = vld [vmem:[#allocation4 + $0x318] sm:$0xff]  ;;  %v102_v34 = vld [vmem:[#allocation4 + $0xd0] sm:$0xff] }
  0x34   :  { %294 = vmatpush.msrb.mxu0 %v138_v62  ;;  %334 = vmatpush.msrb.mxu2 %v139_v63  ;;  %v170_v35 = vld [vmem:[#allocation4 + $0x2f0] sm:$0xff]  ;;  %v103_v36 = vld [vmem:[#allocation4 + $0xd8] sm:$0xff] }
  0x35   :  { %314 = vmatpush.msrb.mxu1 %v202_v3  ;;  %354 = vmatpush.msrb.mxu3 %v203_v5  ;;  %v171_v37 = vld [vmem:[#allocation4 + $0x2f8] sm:$0xff]  ;;  %v98_v38 = vld [vmem:[#allocation4 + $0xb0] sm:$0xff] }
  0x36   :  { %295 = vmatpush.msrb.mxu0 %v134_v2  ;;  %335 = vmatpush.msrb.mxu2 %v135_v4  ;;  %v166_v39 = vld [vmem:[#allocation4 + $0x2d0] sm:$0xff]  ;;  %v99_v40 = vld [vmem:[#allocation4 + $0xb8] sm:$0xff]  ;;  %v204_v2 = vld [vmem:[#allocation6] sm:$0xf] }
  0x37   :  { %315 = vmatpush.msrb.mxu1 %v198_v7  ;;  %355 = vmatpush.msrb.mxu3 %v199_v9  ;;  %v167_v41 = vld [vmem:[#allocation4 + $0x2d8] sm:$0xff]  ;;  %v74_v42 = vld [vmem:[#allocation2] sm:$0xff]  ;;  %v206_v4 = vperm.slane %v204_v2, 0  ;;  %v207_v5 = vperm.slane %v204_v2, 1 }
  0x38   :  { %296 = vmatpush.msrb.mxu0 %v130_v6  ;;  %336 = vmatpush.msrb.mxu2 %v131_v8  ;;  %v94_v43 = vld [vmem:[#allocation4 + $0x90] sm:$0xff]  ;;  %v95_v45 = vld [vmem:[#allocation4 + $0x98] sm:$0xff] }
  0x39   :  { %316 = vmatpush.msrb.mxu1 %v194_v11  ;;  %356 = vmatpush.msrb.mxu3 %v195_v13  ;;  %v162_v44 = vld [vmem:[#allocation4 + $0x2b0] sm:$0xff]  ;;  %v163_v46 = vld [vmem:[#allocation4 + $0x2b8] sm:$0xff]  ;;  %v208_v11 = vperm.slane %v204_v2, 2  ;;  %v378_v13 = vld [vmem:[#allocation7] sm:$0xf] }
  0x3a   :  { %297 = vmatpush.msrb.mxu0 %v126_v10  ;;  %337 = vmatpush.msrb.mxu2 %v127_v12  ;;  %v75_v47 = vld [vmem:[#allocation2 + $0x8] sm:$0xff]  ;;  %v90_v48 = vld [vmem:[#allocation4 + $0x70] sm:$0xff] }
  0x3b   :  { %317 = vmatpush.msrb.mxu1 %v190_v15  ;;  %357 = vmatpush.msrb.mxu3 %v191_v17  ;;  %v158_v49 = vld [vmem:[#allocation4 + $0x290] sm:$0xff]  ;;  %v91_v50 = vld [vmem:[#allocation4 + $0x78] sm:$0xff]  ;;  %v380_v17 = vperm.slane %v378_v13, 0 }
  0x3c   :  { %298 = vmatpush.msrb.mxu0 %v122_v14  ;;  %338 = vmatpush.msrb.mxu2 %v123_v16  ;;  %v159_v51 = vld [vmem:[#allocation4 + $0x298] sm:$0xff]  ;;  %v86_v52 = vld [vmem:[#allocation4 + $0x50] sm:$0xff] }
  0x3d   :  { %318 = vmatpush.msrb.mxu1 %v186_v19  ;;  %358 = vmatpush.msrb.mxu3 %v187_v21  ;;  %v154_v53 = vld [vmem:[#allocation4 + $0x270] sm:$0xff]  ;;  %v87_v54 = vld [vmem:[#allocation4 + $0x58] sm:$0xff] }
  0x3e   :  { %299 = vmatpush.msrb.mxu0 %v118_v18  ;;  %339 = vmatpush.msrb.mxu2 %v119_v20  ;;  %v155_v55 = vld [vmem:[#allocation4 + $0x278] sm:$0xff]  ;;  %v82_v56 = vld [vmem:[#allocation4 + $0x30] sm:$0xff]  ;;  %v381_v18 = vperm.slane %v378_v13, 1 }
  0x3f   :  { %319 = vmatpush.msrb.mxu1 %v182_v23  ;;  %359 = vmatpush.msrb.mxu3 %v183_v25  ;;  %v150_v57 = vld [vmem:[#allocation4 + $0x250] sm:$0xff]  ;;  %v83_v58 = vld [vmem:[#allocation4 + $0x38] sm:$0xff]  ;;  %v209_v23 = vperm.slane %v204_v2, 3  ;;  %v382_v25 = vperm.slane %v378_v13, 2 }
  0x40   :  { %300 = vmatpush.msrb.mxu0 %v114_v22  ;;  %340 = vmatpush.msrb.mxu2 %v115_v24  ;;  %v151_v59 = vld [vmem:[#allocation4 + $0x258] sm:$0xff]  ;;  %v78_v60 = vld [vmem:[#allocation4 + $0x10] sm:$0xff] }
  0x41   :  { %320 = vmatpush.msrb.mxu1 %v178_v27  ;;  %360 = vmatpush.msrb.mxu3 %v179_v29  ;;  %v146_v61 = vld [vmem:[#allocation4 + $0x230] sm:$0xff]  ;;  %v79_v62 = vld [vmem:[#allocation4 + $0x18] sm:$0xff] }
  0x42   :  { %301 = vmatpush.msrb.mxu0 %v110_v26  ;;  %341 = vmatpush.msrb.mxu2 %v111_v28  ;;  %v147_v63 = vld [vmem:[#allocation4 + $0x238] sm:$0xff]  ;;  %v142_v0 = vld [vmem:[#allocation4 + $0x210] sm:$0xff] }
  0x43   :  { %321 = vmatpush.msrb.mxu1 %v174_v31  ;;  %361 = vmatpush.msrb.mxu3 %v175_v33  ;;  %v143_v1 = vld [vmem:[#allocation4 + $0x218] sm:$0xff]  ;;  %v383_v33 = vperm.slane %v378_v13, 3 }
  0x44   :  { %302 = vmatpush.msrb.mxu0 %v106_v30  ;;  %342 = vmatpush.msrb.mxu2 %v107_v32 }
  0x45   :  { %322 = vmatpush.msrb.mxu1 %v170_v35  ;;  %362 = vmatpush.msrb.mxu3 %v171_v37 }
  0x46   :  { %303 = vmatpush.msrb.mxu0 %v102_v34  ;;  %343 = vmatpush.msrb.mxu2 %v103_v36 }
  0x47   :  { %323 = vmatpush.msrb.mxu1 %v166_v39  ;;  %363 = vmatpush.msrb.mxu3 %v167_v41 }
  0x48   :  { %304 = vmatpush.msrb.mxu0 %v98_v38  ;;  %344 = vmatpush.msrb.mxu2 %v99_v40 }
  0x49   :  { %270 = vmatmul.f32.vlgmr.msra.gmra.mxu2 %v74_v42  ;;  %324 = vmatpush.msrb.mxu1 %v162_v44 }
  0x4a   :  { %305 = vmatpush.msrb.mxu0 %v94_v43  ;;  %345 = vmatpush.msrb.mxu2 %v95_v45 }
  0x4b   :  { %364 = vmatpush.msrb.mxu3 %v163_v46  ;;  %230 = vmatmul.f32.vlgmr.msra.gmra.mxu0 %v74_v42 }
  0x4c   :  { %290 = vmatmul.f32.vlgmr.msra.gmra.mxu3 %v75_v47  ;;  %306 = vmatpush.msrb.mxu0 %v90_v48 }
  0x4d   :  { %325 = vmatpush.msrb.mxu1 %v158_v49  ;;  %346 = vmatpush.msrb.mxu2 %v91_v50 }
  0x4e   :  { %365 = vmatpush.msrb.mxu3 %v159_v51  ;;  %250 = vmatmul.f32.vlgmr.msra.gmra.mxu1 %v75_v47 }
  0x4f   :  { %307 = vmatpush.msrb.mxu0 %v86_v52  ;;  %326 = vmatpush.msrb.mxu1 %v154_v53 }
  0x50   :  { %347 = vmatpush.msrb.mxu2 %v87_v54  ;;  %366 = vmatpush.msrb.mxu3 %v155_v55 }
  0x51   :  { %308 = vmatpush.msrb.mxu0 %v82_v56  ;;  %327 = vmatpush.msrb.mxu1 %v150_v57 }
  0x52   :  { %348 = vmatpush.msrb.mxu2 %v83_v58  ;;  %367 = vmatpush.msrb.mxu3 %v151_v59 }
  0x53   :  { %309 = vmatpush.msrb.mxu0 %v78_v60  ;;  %328 = vmatpush.msrb.mxu1 %v146_v61 }
  0x54   :  { %349 = vmatpush.msrb.mxu2 %v79_v62  ;;  %368 = vmatpush.msrb.mxu3 %v147_v63 }
  0x55   :  { %310 = vmatmul.f32.vlgmr.msrb.gmra.mxu0 %v74_v42  ;;  %350 = vmatmul.f32.vlgmr.msrb.gmra.mxu2 %v74_v42 }
  0x56   :  { %329 = vmatpush.msrb.mxu1 %v142_v0  ;;  %369 = vmatpush.msrb.mxu3 %v143_v1 }
  0x57   :  { %330 = vmatmul.f32.vlgmr.msrb.gmra.mxu1 %v75_v47  ;;  %370 = vmatmul.f32.vlgmr.msrb.gmra.mxu3 %v75_v47 }
  0xc8   :  { %v231_v3 = vpop.f32.mrf.mxu0 }
  0xc9   :  { %v232_v8 = vadd.f32 %v231_v3, %v206_v4 }
  0xcb   :  { %v251_v6 = vpop.f32.mrf.mxu1 }
  0xcc   :  { %v271_v7 = vpop.f32.mrf.mxu2  ;;  %v252_v12 = vadd.f32 %v251_v6, %v232_v8 }
  0xcd   :  { %v272_v9 = vadd.f32 %v271_v7, %v207_v5 }
  0xce   :  { %v374_v20 = vmax.f32 %v252_v12, 0.0 }
  0xcf   :  { %v291_v10 = vpop.f32.mrf.mxu3 }
  0xd0   :  { %v292_v14 = vadd.f32 %v291_v10, %v272_v9  ;;  %v388_v27 = vmul.f32 %v380_v17, %v374_v20 }
  0xd2   :  { %v311_v15 = vpop.f32.mrf.mxu0  ;;  %v375_v21 = vmax.f32 %v292_v14, 0.0 }
  0xd3   :  { %v312_v16 = vadd.f32 %v311_v15, %v208_v11 }
  0xd4   :  { %v331_v19 = vpop.f32.mrf.mxu1  ;;  %v389_v28 = vmul.f32 %v381_v18, %v375_v21 }
  0xd5   :  { %v332_v22 = vadd.f32 %v331_v19, %v312_v16 }
  0xd6   :  { %v392_v35 = vadd.f32 %v389_v28, %v388_v27 }
  0xd7   :  { %v376_v24 = vmax.f32 %v332_v22, 0.0 }
  0xd8   :  { %v351_v26 = vpop.f32.mrf.mxu2 }
  0xd9   :  { %v352_v29 = vadd.f32 %v351_v26, %v209_v23  ;;  %v390_v31 = vmul.f32 %v382_v25, %v376_v24 }
  0xda   :  { %v371_v30 = vpop.f32.mrf.mxu3 }
  0xdb   :  { %v372_v32 = vadd.f32 %v371_v30, %v352_v29  ;;  %v393_v37 = vadd.f32 %v392_v35, %v390_v31 }
  0xdd   :  { %v377_v34 = vmax.f32 %v372_v32, 0.0 }
  0xdf   :  { %v391_v36 = vmul.f32 %v383_v33, %v377_v34 }
  0xe1   :  { %v394_v38 = vadd.f32 %v393_v37, %v391_v36 }
  0xe3   :  { %395 = vadd.xlane.f32.xlu0 %v394_v38 }
 0x156   :  { %v396_v39 = vpop.xlane.xlu0 %395 }
 0x157   :  { %v427_v40 = vclamps-f32 %v396_v39, 60.0 }
 0x159   :  { %v399_v41 = vsub.f32 0.0, %v427_v40 }
 0x15b   :  { %v400_v42 = vmul.f32 1.442695, %v399_v41 }
 0x15d   :  { %434 = vpow2.f32 %v400_v42 }
 0x163   :  { %v435_v43 = vpop.eup %434 }
 0x164   :  { %v402_v44 = vadd.f32 1.0, %v435_v43 }
 0x166   :  { %436 = vrcp.f32 %v402_v44  ;;  %v414_v48 = vand.u32 2147483648, %v402_v44  ;;  %v412_v50 = vand.u32 2147483647, %v402_v44  ;;  %vm408_vm1 = vweird.f32 %v402_v44 }
 0x168   :  { %v415_v52 = vor.u32 1.1754944e-38, %v414_v48  ;;  %vm413_vm4 = vcmp.eq.f32.partialorder %v412_v50, 8.507059e+37 }
 0x16c   :  { %v437_v45 = vpop.eup %436 }
 0x16d   :  { %v404_v46 = vmul.f32 %v437_v45, %v402_v44  ;;  %vm409_vm0 = vweird.f32 %v437_v45 }
 0x16e   :  { %vm410_vm2 = vmor %vm408_vm1, %vm409_vm0 }
 0x16f   :  { %v405_v47 = vsub.f32 1.0, %v404_v46 }
 0x171   :  { %v406_v49 = vmul.f32 %v437_v45, %v405_v47 }
 0x173   :  { %v407_v51 = vadd.f32 %v437_v45, %v406_v49 }
 0x175   :  { %v411_v53 = vsel %vm410_vm2, %v437_v45, %v407_v51 }
 0x176   :  { %v416_v54 = vsel %vm413_vm4, %v415_v52, %v411_v53 }
 0x177   :  { %419 = vst.msk [vmem:[%s590_s4] sm:$0xff] %vm418_vm3, %v416_v54 }
 0x178   :  { %424 = vsyncpa [#allocation3], 1 }
 0x179   :  { %425 = vsyncpa [#allocation5], 1 }
 0x17a   :  { %426 = vsyncpa [#allocation8], 1 }

</bundles_post_ra>
